<compile_context>
chip_gen: v7x
topology: tpu7x:2x2x1
jax: 0.10.0
libtpu: 0.0.40
codegen_flags: <defaults>
</compile_context>

<pallas_src>
import jax
import jax.numpy as jnp
from jax import lax
from jax.experimental import pallas as pl
from jax.experimental.pallas import tpu as pltpu

_LANES = 128
_TARGET_BLOCK_BYTES = 3_670_016   # ~3.5 MiB: 2 arrays x 2 buffers = 14 MiB (< v5e 16 MiB)
_FLOOR_BLOCK_BYTES = 1 << 20      # never shred blocks below ~1 MiB
_MIN_BLOCKS = 8                   # keep >=8 row-blocks so both v7x TCs get work


def _round_up(x, m):
    return ((x + m - 1) // m) * m


def _i32(v):
    """Python int -> int32 value carrying the uint32 bit pattern (two's complement)."""
    v &= 0xFFFFFFFF
    return v - (1 << 32) if v >= (1 << 31) else v


def _infer_kernel(scale_ref, x_ref, o_ref):
    # out = x * (1 - p); scale lives in SMEM so p is not a trace-time constant.
    o_ref[...] = (x_ref[...] * scale_ref[0]).astype(o_ref.dtype)


def _train_kernel(sc_ref, x_ref, o_ref):
    # out = x * mask, mask ~ Bernoulli(keep = 1 - p).
    # Stateless hash of the global flat element index (tiling-invariant) mixed
    # with the seed; keep iff hash_bits (as uint32) < threshold (as uint32).
    shape = x_ref.shape
    block_rows, cols = shape
    base = pl.program_id(0) * (block_rows * cols)
    idx = (base
           + lax.broadcasted_iota(jnp.int32, shape, 0) * cols
           + lax.broadcasted_iota(jnp.int32, shape, 1))
    seed = sc_ref[0]
    thr = sc_ref[1]
    # murmur3-style fmix32; int32 arithmetic wraps mod 2^32 (same bits as uint32).
    h = idx * jnp.int32(_i32(0x9E3779B1)) + seed * jnp.int32(_i32(0x85EBCA77))
    h = h ^ lax.shift_right_logical(h, 16)
    h = h * jnp.int32(_i32(0x85EBCA6B))
    h = h ^ lax.shift_right_logical(h, 13)
    h = h * jnp.int32(_i32(0xC2B2AE35))
    h = h ^ lax.shift_right_logical(h, 16)
    sign = jnp.int32(_i32(0x80000000))
    keep = (h ^ sign) < (thr ^ sign)          # unsigned compare via sign-flip
    o_ref[...] = jnp.where(keep, x_ref[...], jnp.zeros((), x_ref.dtype))


def _lane_dense_layout(n, itemsize):
    """Pick (rows, cols, block_rows): cols % 128 == 0; rows*cols == n exactly
    (zero-copy) when n % 128 == 0, else the flat buffer is padded to rows*cols.
    Block sizing is byte-targeted and respects dtype sublane packing."""
    packing = max(1, 4 // itemsize)
    sub = 8 * packing                              # sublane multiple for dtype
    if n % _LANES == 0:
        m = n // _LANES
        c = 8
        while c > 1 and m % c:
            c //= 2
        cols = _LANES * c
        rows = n // cols
    else:
        cols = min(1024, _LANES * pl.cdiv(n, _LANES))
        rows = pl.cdiv(n, cols)
    row_bytes = cols * itemsize
    target = max(sub, (_TARGET_BLOCK_BYTES // row_bytes) // sub * sub)
    floor = max(sub, (_FLOOR_BLOCK_BYTES // row_bytes) // sub * sub)
    cap = _round_up(pl.cdiv(rows, _MIN_BLOCKS), sub)
    block_rows = min(target, max(cap, floor))
    if block_rows >= rows:
        block_rows = rows          # single full-extent block (always legal)
    return rows, cols, block_rows


def dropout_infer_downscale(x, p=0.5, *, training=False, seed=0):
    """Pallas TPU implementation of DropoutInferDownscale.forward."""
    orig_shape, orig_dtype = x.shape, x.dtype
    n = x.size
    if n == 0:
        return x

    rows, cols, block_rows = _lane_dense_layout(n, jnp.dtype(orig_dtype).itemsize)
    total = rows * cols
    flat = x.reshape(-1)
    if total != n:
        # TODO(synk): ragged sizes (n % 128 != 0) still take one pad + one slice
        # copy; the aligned case (all shapes below) is fully zero-copy.
        flat = jnp.pad(flat, (0, total - n))
    x2d = flat.reshape(rows, cols)

    grid = (pl.cdiv(rows, block_rows),)            # partial last block is masked
    data_spec = pl.BlockSpec((block_rows, cols), lambda i: (i, 0))
    smem_spec = pl.BlockSpec(memory_space=pltpu.MemorySpace.SMEM)
    params = pltpu.CompilerParams(dimension_semantics=("parallel",))

    if training:
        thr = int(round((1.0 - float(p)) * 4294967296.0))
        thr = max(0, min(thr, 0xFFFFFFFF))
        scalars = jnp.asarray([_i32(int(seed)), _i32(thr)], jnp.int32)
        kern = _train_kernel
    else:
        scalars = jnp.asarray([1.0 - float(p)], jnp.float32)
        kern = _infer_kernel

    out2d = pl.pallas_call(
        kern,
        out_shape=jax.ShapeDtypeStruct((rows, cols), orig_dtype),
        grid=grid,
        in_specs=[smem_spec, data_spec],
        out_specs=data_spec,
        compiler_params=params,
    )(scalars, x2d)

    out = out2d.reshape(-1)
    if total != n:
        out = out[:n]
    return out.reshape(orig_shape)


if __name__ == "__main__":
    p = 0.5
    key = jax.random.PRNGKey(0)
    k1, k2, k3 = jax.random.split(key, 3)

    # Small NCHW feature map, consistent with the PP-HGNetV2 dropout site.
    x = jax.random.normal(k1, (2, 4, 16, 16), jnp.float32)

    # Inference ("downscale_in_infer"): out = x * (1 - p).
    out = jax.block_until_ready(dropout_infer_downscale(x, p=p))
    assert out.shape == x.shape and out.dtype == x.dtype
    assert jnp.allclose(out, x * (1.0 - p), rtol=1e-6, atol=1e-6), "inference mismatch"

    # Larger input: multi-block, padding-free, pipelined grid.
    xl = jax.random.normal(k2, (4, 64, 64, 64), jnp.float32)
    outl = jax.block_until_ready(dropout_infer_downscale(xl, p=0.3))
    assert jnp.allclose(outl, xl * (1.0 - 0.3), rtol=1e-6, atol=1e-6)

    # bf16 input exercises the dtype-aware (sublane-packed) block layout.
    xb = jax.random.normal(k3, (2, 4, 16, 16), jnp.bfloat16)
    outb = jax.block_until_ready(dropout_infer_downscale(xb, p=0.25))
    refb = (xb.astype(jnp.float32) * jnp.float32(0.75)).astype(jnp.bfloat16)
    assert jnp.allclose(outb.astype(jnp.float32), refb.astype(jnp.float32),
                        rtol=1e-2, atol=1e-2)

    # Ragged size (n % 128 != 0) exercises the padded fallback path.
    xr = jax.random.normal(k1, (3, 5, 7), jnp.float32)
    outr = jax.block_until_ready(dropout_infer_downscale(xr, p=0.1))
    assert jnp.allclose(outr, xr * 0.9, rtol=1e-6, atol=1e-6)

    # Training: out = x * mask, mask ~ Bernoulli(keep = 1 - p), no rescale.
    out_tr = jax.block_until_ready(
        dropout_infer_downscale(x, p=p, training=True, seed=1234))
    dropped = (out_tr == 0)
    kept_ok = jnp.isclose(out_tr, x, rtol=1e-6, atol=1e-6)
    assert bool(jnp.all(dropped | kept_ok)), "training output is not x * mask"
    keep_frac = 1.0 - float(jnp.mean(dropped.astype(jnp.float32)))
    assert 0.35 < keep_frac < 0.65, f"keep fraction {keep_frac} far from 1-p"

    print("KERNEL_OK")
</pallas_src>

<mosaic_0001>
module attributes {stable_mosaic.version = 11 : i64} {
  func.func @_infer_kernel(%arg0: i32, %arg1: memref<1xf32, #tpu.memory_space<smem>>, %arg2: memref<2x1024xf32, #tpu.memory_space<vmem>>, %arg3: memref<2x1024xf32, #tpu.memory_space<vmem>>) attributes {dimension_semantics = [#tpu.dimension_semantics<parallel>], iteration_bounds = array<i64: 1>, scalar_prefetch = 0 : i64, scratch_operands = 0 : i64, tpu.core_type = #tpu.core_type<tc>, window_params = [{transform_indices = @transform_0, window_bounds = array<i64: 1>}, {transform_indices = @transform_1, window_bounds = array<i64: 2, 1024>}, {transform_indices = @transform_2, window_bounds = array<i64: 2, 1024>}]} {
    %c0 = arith.constant 0 : index
    %c0_0 = arith.constant 0 : index
    %0 = vector.load %arg2[%c0, %c0_0] : memref<2x1024xf32, #tpu.memory_space<vmem>>, vector<2x1024xf32>
    %c0_1 = arith.constant 0 : index
    %1 = memref.load %arg1[%c0_1] : memref<1xf32, #tpu.memory_space<smem>>
    %2 = vector.broadcast %1 : f32 to vector<2x1024xf32>
    %3 = arith.mulf %0, %2 : vector<2x1024xf32>
    %c0_2 = arith.constant 0 : index
    %c0_3 = arith.constant 0 : index
    %4 = vector.load %arg3[%c0_2, %c0_3] : memref<2x1024xf32, #tpu.memory_space<vmem>>, vector<2x1024xf32>
    tpu.vector_store %arg3[%c0_2, %c0_3], %3 {strides = array<i32>} : memref<2x1024xf32, #tpu.memory_space<vmem>>, vector<2x1024xf32>,
    return
  }
  func.func @transform_0(%arg0: i32) -> i32 {
    %c0_i32 = arith.constant 0 : i32
    %c0_i32_0 = arith.constant 0 : i32
    return %c0_i32 : i32
  }
  func.func @transform_1(%arg0: i32) -> (i32, i32) {
    %c0_i32 = arith.constant 0 : i32
    %c0_i32_0 = arith.constant 0 : i32
    return %arg0, %c0_i32 : i32, i32
  }
  func.func @transform_2(%arg0: i32) -> (i32, i32) {
    %c0_i32 = arith.constant 0 : i32
    %c0_i32_0 = arith.constant 0 : i32
    return %arg0, %c0_i32 : i32, i32
  }
}

</mosaic_0001>

<bundles_post_ra>
// kernel: tpu_custom_call.1
= control target key start
LH: loop header
LB: loop body
LE: loop exit
PB: predicated region body
PF: predicated region fallthrough
CT: control target
= control target key end

     0   :  { %8 = vsyncpa [#allocation4], 0  ;;  %s142_s0 = inlined_call_operand.<no memory space> [shape: f32[1], index: 0, kind: input, shape index: {}]   ;;  %s143_s1 = inlined_call_operand.hbm [shape: f32[2,1024], index: 1, kind: input, shape index: {}]   ;;  %s144_s2 = inlined_call_operand.hbm [shape: f32[2,1024], index: 2, kind: output, shape index: {}]  }
   0x1   :  { %9 = vsyncpa [#allocation5], 0  ;;  %s98_s9 = smov [#allocation3]   ;;  %s50_s13 = scalar_lea.hbm %s143_s1, 256 }
   0x2   :  { %s18_s10 = sshll.u32 %s98_s9, 4  ;;  %p51_p0 = scmp.ne.s32.totalorder %s143_s1, %s50_s13  ;;  %s19_s10 = int_to_ptr.vmem [resolvable:$true] %s18_s10 }
   0x3   :  { %p54_p1 = scmp.lt.u32.totalorder %s50_s13, %s143_s1 }
   0x5   :  { %p56_p2 = pnand %p54_p1, %p51_p0 }
   0x7   :  { %59 = shalt.err (!%p56_p2)
}
   0x8   :  { %s60_s18 = scalar_lea.vmem %s19_s10, 256  ;;  %p65_p4 = scmp.lt.s32.totalorder %s19_s10, %s19_s10 }
   0x9   :  { %p61_p3 = scmp.ne.s32.totalorder %s19_s10, %s60_s18  ;;  %p66_p5 = scmp.lt.s32.totalorder %s60_s18, %s60_s18 }
   0xb   :  { %p67_p6 = por %p66_p5, %p65_p4 }
   0xd   :  { %p68_p7 = pnand %p67_p6, %p61_p3 }
   0xf   :  { %71 = shalt.err (!%p68_p7)
}
  0x10   :  { %21 = dma.hbm_to_vmem [thread:$0]  %s143_s1, 256, %s19_s10, [#allocation4]  }
  0x11   :  { %94 = dma.done.wait [#allocation4], 256  }
  0x12   :  { %95 = vsyncadd [#allocation4], 4294967040  ;;  %v28_v0 = vstv %s142_s0  ;;  %s99_s23 = smov [#allocation6]   ;;  %v25_v1 = vld [vmem:[#allocation3] sm:$0xff]  ;;  %v26_v2 = vld [vmem:[#allocation3 + $0x8] sm:$0xff] }
  0x13   :  { %s39_s24 = sshll.u32 %s99_s23, 4  ;;  %v29_v3 = vmul.f32 %v28_v0, %v25_v1  ;;  %v30_v4 = vmul.f32 %v28_v0, %v26_v2  ;;  %s40_s24 = int_to_ptr.vmem [resolvable:$true] %s39_s24 }
  0x14   :  { %s72_s25 = scalar_lea.vmem %s40_s24, 256  ;;  %p77_p9 = scmp.lt.s32.totalorder %s40_s24, %s40_s24 }
  0x15   :  { %31 = vst [vmem:[#allocation6] sm:$0xff] %v29_v3  ;;  %32 = vst [vmem:[#allocation6 + $0x8] sm:$0xff] %v30_v4  ;;  %p73_p8 = scmp.ne.s32.totalorder %s40_s24, %s72_s25  ;;  %p78_p10 = scmp.lt.s32.totalorder %s72_s25, %s72_s25 }
  0x17   :  { %p79_p11 = por %p78_p10, %p77_p9 }
  0x19   :  { %p80_p12 = pnand %p79_p11, %p73_p8 }
  0x1b   :  { %83 = shalt.err (!%p80_p12)
}
  0x1c   :  { %s84_s0 = scalar_lea.hbm %s144_s2, 256 }
  0x1d   :  { %p85_p13 = scmp.ne.s32.totalorder %s144_s2, %s84_s0  ;;  %p88_p0 = scmp.lt.u32.totalorder %s84_s0, %s144_s2 }
  0x1f   :  { %p90_p1 = pnand %p88_p0, %p85_p13 }
  0x21   :  { %93 = shalt.err (!%p90_p1)
}
  0x22   :  { %42 = dma.vmem_to_hbm [thread:$0]  %s40_s24, 256, %s144_s2, [#allocation5]  }
  0x23   :  { %96 = dma.done.wait [#allocation5], 256  }
  0x24   :  { %97 = vsyncadd [#allocation5], 4294967040 }
  0x25   :  { %46 = vsyncpa [#allocation4], 1 }
  0x26   :  { %47 = vsyncpa [#allocation5], 1 }

</bundles_post_ra>
